<compile_context>
chip_gen: v7x
topology: tpu7x:2x2x1
jax: 0.10.0
libtpu: 0.0.40
codegen_flags: <defaults>
</compile_context>

<pallas_src>
import numpy as np

import jax
import jax.numpy as jnp
from jax.experimental import pallas as pl
from jax.experimental.pallas import tpu as pltpu


def _print_layer_kernel(x_ref, o_ref):
    # Data path is identity and the output buffer aliases the input buffer,
    # so there is nothing to copy and nothing to DMA.  Keep only the runtime
    # print hook (kept alive by has_side_effects=True).
    del x_ref, o_ref
    pl.debug_print("PrintLayer forward")


def print_layer(x: jax.Array) -> jax.Array:
    """Pallas equivalent of PrintLayer.forward: print shape, return x."""
    # Trace-time shape print (mirrors `print(x.shape)`; shapes are static).
    print(tuple(x.shape))

    return pl.pallas_call(
        _print_layer_kernel,
        out_shape=jax.ShapeDtypeStruct(x.shape, x.dtype),
        in_specs=[pl.BlockSpec(memory_space=pl.ANY)],   # stay in HBM
        out_specs=pl.BlockSpec(memory_space=pl.ANY),    # stay in HBM
        input_output_aliases={0: 0},                    # in-place pass-through
        compiler_params=pltpu.CompilerParams(has_side_effects=True),
        cost_estimate=pl.CostEstimate(flops=0, transcendentals=0,
                                      bytes_accessed=0),
    )(x)


# Donate x at the jit boundary so the alias is actually realized (output
# reuses x's HBM buffer; no second allocation, no defensive copy).
print_layer_donated = jax.jit(print_layer, donate_argnums=0)


if __name__ == "__main__":
    key = jax.random.PRNGKey(0)
    # NCHW input consistent with the autoencoder context: batch=2, C=4, H=W=16.
    x = jax.random.normal(key, (2, 4, 16, 16), dtype=jnp.float32)

    # Host-side reference copy taken BEFORE the call so x can be donated.
    x_host = np.asarray(x)

    y = print_layer_donated(x)
    y = jax.block_until_ready(y)

    assert y.shape == x_host.shape
    assert y.dtype == jnp.float32
    assert np.array_equal(np.asarray(y), x_host)
    print("KERNEL_OK")
</pallas_src>

<mosaic_0001>
module attributes {stable_mosaic.version = 11 : i64} {
  func.func @_print_layer_kernel(%arg0: memref<2x4x16x16xf32, #tpu.memory_space<any>>, %arg1: memref<2x4x16x16xf32, #tpu.memory_space<any>>) attributes {dimension_semantics = [], scalar_prefetch = 0 : i64, scratch_operands = 0 : i64, tpu.core_type = #tpu.core_type<tc>} {
    tpu.log "PrintLayer forward"
    return
  }
}

</mosaic_0001>

<bundles_post_ra>
// kernel: print_layer.1
= control target key start
LH: loop header
LB: loop body
LE: loop exit
PB: predicated region body
PF: predicated region fallthrough
CT: control target
= control target key end

     0   :  { %s18_s0 = inlined_call_operand.hbm [shape: f32[2,4,16,16], index: 0, kind: input, shape index: {}, may-alias: {0,1}]   ;;  %s19_s1 = inlined_call_operand.hbm [shape: f32[2,4,16,16], index: 1, kind: output, shape index: {}, may-alias: {0,1}]  }

</bundles_post_ra>
